<compile_context>
chip_gen: v6e
topology: v6e:2x2x1
jax: 0.10.0
libtpu: 0.0.40
codegen_flags: <defaults>
</compile_context>

<pallas_src>
import jax
import jax.numpy as jnp
from jax.experimental import pallas as pl
from jax.experimental.pallas import tpu as pltpu


def _round_up(n, m):
    return ((n + m - 1) // m) * m


def _actor_kernel(x_ref, w1_ref, b1_ref, w2_ref, b2_ref, w3_ref, b3_ref,
                  scale_ref, offset_ref, o_ref):
    """One batch tile of: relu(l1) -> relu(l2) -> tanh(l3) -> affine rescale."""
    mxu_dt = w2_ref.dtype   # bf16 on the fast path; f32 on the debug path

    # Layer 1: Linear(state -> H1) + ReLU (f32 accumulate / elementwise)
    h1 = jnp.dot(x_ref[...], w1_ref[...], preferred_element_type=jnp.float32)
    h1 = jnp.maximum(h1 + b1_ref[...], 0.0).astype(mxu_dt)

    # Layer 2: Linear(H1 -> H2) + ReLU
    h2 = jnp.dot(h1, w2_ref[...], preferred_element_type=jnp.float32)
    h2 = jnp.maximum(h2 + b2_ref[...], 0.0).astype(mxu_dt)

    # Layer 3: Linear(H2 -> action) + tanh, fused per-dim rescale (FMA)
    h3 = jnp.dot(h2, w3_ref[...], preferred_element_type=jnp.float32)
    h3 = jnp.tanh(h3 + b3_ref[...])
    o_ref[...] = (h3 * scale_ref[...] + offset_ref[...]).astype(o_ref.dtype)


def prepare_actor_params(params, max_action, min_action, *,
                         compute_dtype=jnp.bfloat16):
    """One-time pad/cast of the static weights and action-bound vectors.

    Weights are stored transposed w.r.t. nn.Linear, i.e. (in, out). Hidden dims
    pad 400->512 and 300->384, action dim pads to 128 (lane-dense output slab).
    Zero padding is numerically exact; padded lanes/rows are sliced off later.
    The layer-1 contraction dim (state_dim) is deliberately NOT padded.
    """
    S, h1 = params["w1"].shape
    h2 = params["w2"].shape[1]
    action_dim = params["w3"].shape[1]

    H1 = _round_up(h1, 128)            # 400 -> 512
    H2 = _round_up(h2, 128)            # 300 -> 384
    A_pad = _round_up(action_dim, 128)

    def pad2(a, rows, cols, dtype):
        return jnp.pad(a, ((0, rows - a.shape[0]),
                           (0, cols - a.shape[1]))).astype(dtype)

    # Scalar or per-dimension action bounds -> (1, A_pad) scale/offset vectors:
    #   out = tanh(.) * scale + offset  ==  (tanh(.) + 1) * (max-min)/2 + min
    max_a = jnp.broadcast_to(jnp.asarray(max_action, jnp.float32), (action_dim,))
    min_a = jnp.broadcast_to(jnp.asarray(min_action, jnp.float32), (action_dim,))
    scale = (max_a - min_a) * 0.5
    offset = scale + min_a

    prepped = {
        "w1": pad2(params["w1"], S, H1, compute_dtype),
        "w2": pad2(params["w2"], H1, H2, compute_dtype),
        "w3": pad2(params["w3"], H2, A_pad, compute_dtype),
        # Biases / rescale stay f32: the elementwise tail is f32 on every chip.
        "b1": pad2(params["b1"], 1, H1, jnp.float32),
        "b2": pad2(params["b2"], 1, H2, jnp.float32),
        "b3": pad2(params["b3"], 1, A_pad, jnp.float32),
        "scale": jnp.pad(scale, (0, A_pad - action_dim)).reshape(1, A_pad),
        "offset": jnp.pad(offset, (0, A_pad - action_dim)).reshape(1, A_pad),
    }
    return prepped, action_dim


def _pick_tile_b(B, desired):
    """Batch tile: large enough to amortize ~0.35us/grid-step overhead, but
    sized so batches that are big enough still give >= 2 grid steps (keeps
    both v7x TensorCores busy). Always a multiple of 8 sublanes."""
    B8 = _round_up(max(B, 1), 8)
    half = _round_up(pl.cdiv(B8, 2), 8)
    if B8 <= desired:
        return half if B8 >= 256 else B8
    return min(desired, half)


def actor_forward(x, prepped, action_dim, *, tile_b=1024,
                  out_dtype=jnp.float32):
    """Batch-tiled Pallas forward. Jit this (or use make_actor) so the batch
    pad / cast / output slice fuse with the kernel launch."""
    B, S = x.shape
    compute_dtype = prepped["w1"].dtype
    H1 = prepped["w1"].shape[1]
    H2 = prepped["w2"].shape[1]
    A_pad = prepped["w3"].shape[1]
    assert prepped["w1"].shape[0] == S, "state_dim mismatch"

    tb = _pick_tile_b(B, tile_b)
    B_pad = _round_up(B, tb)
    grid = (B_pad // tb,)

    # Only the batch dim of x is padded (to a tile multiple); K stays unpadded.
    x_p = jnp.pad(x, ((0, B_pad - B), (0, 0))).astype(compute_dtype)

    def const_spec(shape):
        # Same block every grid step -> stays resident in VMEM (no re-DMA).
        return pl.BlockSpec(shape, lambda i: (0, 0))

    out = pl.pallas_call(
        _actor_kernel,
        out_shape=jax.ShapeDtypeStruct((B_pad, A_pad), out_dtype),
        grid=grid,
        in_specs=[
            pl.BlockSpec((tb, S), lambda i: (i, 0)),     # x: walk the batch
            const_spec((S, H1)), const_spec((1, H1)),
            const_spec((H1, H2)), const_spec((1, H2)),
            const_spec((H2, A_pad)), const_spec((1, A_pad)),
            const_spec((1, A_pad)), const_spec((1, A_pad)),
        ],
        out_specs=pl.BlockSpec((tb, A_pad), lambda i: (i, 0)),
        compiler_params=pltpu.CompilerParams(
            dimension_semantics=("parallel",),   # shard batch tiles across TCs
        ),
    )(x_p, prepped["w1"], prepped["b1"], prepped["w2"], prepped["b2"],
      prepped["w3"], prepped["b3"], prepped["scale"], prepped["offset"])

    # Strip batch / action padding.
    return out[:B, :action_dim]


def make_actor(params, max_action, min_action, *, compute_dtype=jnp.bfloat16,
               out_dtype=jnp.float32, tile_b=1024):
    """Pad/cast weights once and return a jitted forward(x) closure."""
    prepped, action_dim = prepare_actor_params(
        params, max_action, min_action, compute_dtype=compute_dtype)

    @jax.jit
    def forward(x):
        return actor_forward(x, prepped, action_dim,
                             tile_b=tile_b, out_dtype=out_dtype)

    return forward


def init_actor_params(key, state_dim, action_dim):
    """Deterministic synthetic parameters matching nn.Linear shapes
    (stored transposed: (in, out)), uniform(-1/sqrt(fan_in)) init."""
    ks = jax.random.split(key, 6)

    def lin(kw, kb, fan_in, fan_out):
        bound = 1.0 / jnp.sqrt(float(fan_in))
        w = jax.random.uniform(kw, (fan_in, fan_out), jnp.float32, -bound, bound)
        b = jax.random.uniform(kb, (1, fan_out), jnp.float32, -bound, bound)
        return w, b

    w1, b1 = lin(ks[0], ks[1], state_dim, 400)
    w2, b2 = lin(ks[2], ks[3], 400, 300)
    w3, b3 = lin(ks[4], ks[5], 300, action_dim)
    return {"w1": w1, "b1": b1, "w2": w2, "b2": b2, "w3": w3, "b3": b3}


def actor_reference(x, params, max_action, min_action):
    """Pure-JAX reference for correctness checking."""
    h1 = jnp.maximum(x @ params["w1"] + params["b1"], 0.0)
    h2 = jnp.maximum(h1 @ params["w2"] + params["b2"], 0.0)
    h3 = jnp.tanh(h2 @ params["w3"] + params["b3"])
    return (h3 + 1.0) * (max_action - min_action) / 2.0 + min_action


if __name__ == "__main__":
    key = jax.random.PRNGKey(0)
    k_param, k_x = jax.random.split(key)

    batch = 2
    state_dim = 32
    action_dim = 4
    max_action = 2.0
    min_action = -2.0

    params = init_actor_params(k_param, state_dim, action_dim)
    x = jax.random.normal(k_x, (batch, state_dim), dtype=jnp.float32)

    ref = actor_reference(x, params, max_action, min_action)

    # f32 debug path: tight tolerance.
    actor_f32 = make_actor(params, max_action, min_action,
                           compute_dtype=jnp.float32)
    out_f32 = jax.block_until_ready(actor_f32(x))
    assert out_f32.shape == (batch, action_dim)
    assert jnp.allclose(out_f32, ref, atol=1e-5, rtol=1e-5), (out_f32, ref)

    # bf16 MXU path (default fast path): loose tolerance vs f32 reference.
    actor_bf16 = make_actor(params, max_action, min_action)
    out_bf16 = jax.block_until_ready(actor_bf16(x))
    assert out_bf16.shape == (batch, action_dim)
    assert jnp.allclose(out_bf16, ref, atol=1e-1), (out_bf16, ref)

    # Per-dimension action bounds (arrays), exercised on the f32 path.
    max_vec = jnp.array([2.0, 1.0, 0.5, 3.0], dtype=jnp.float32)
    min_vec = jnp.array([-2.0, -1.0, -0.25, -3.0], dtype=jnp.float32)
    ref_vec = actor_reference(x, params, max_vec, min_vec)
    actor_vec = make_actor(params, max_vec, min_vec, compute_dtype=jnp.float32)
    out_vec = jax.block_until_ready(actor_vec(x))
    assert out_vec.shape == (batch, action_dim)
    assert jnp.allclose(out_vec, ref_vec, atol=1e-5, rtol=1e-5), (out_vec, ref_vec)

    print("KERNEL_OK")
</pallas_src>

<mosaic_0001>
module attributes {stable_mosaic.version = 11 : i64} {
  func.func @_actor_kernel(%arg0: i32, %arg1: memref<8x32xf32, #tpu.memory_space<vmem>>, %arg2: memref<32x512xf32, #tpu.memory_space<vmem>>, %arg3: memref<1x512xf32, #tpu.memory_space<vmem>>, %arg4: memref<512x384xf32, #tpu.memory_space<vmem>>, %arg5: memref<1x384xf32, #tpu.memory_space<vmem>>, %arg6: memref<384x128xf32, #tpu.memory_space<vmem>>, %arg7: memref<1x128xf32, #tpu.memory_space<vmem>>, %arg8: memref<1x128xf32, #tpu.memory_space<vmem>>, %arg9: memref<1x128xf32, #tpu.memory_space<vmem>>, %arg10: memref<8x128xf32, #tpu.memory_space<vmem>>) attributes {dimension_semantics = [#tpu.dimension_semantics<parallel>], iteration_bounds = array<i64: 1>, scalar_prefetch = 0 : i64, scratch_operands = 0 : i64, tpu.core_type = #tpu.core_type<tc>, window_params = [{transform_indices = @transform_0, window_bounds = array<i64: 8, 32>}, {pipeline_mode = #tpu.pipeline_mode<synchronous>, transform_indices = @transform_1, window_bounds = array<i64: 32, 512>}, {pipeline_mode = #tpu.pipeline_mode<synchronous>, transform_indices = @transform_2, window_bounds = array<i64: 1, 512>}, {pipeline_mode = #tpu.pipeline_mode<synchronous>, transform_indices = @transform_3, window_bounds = array<i64: 512, 384>}, {pipeline_mode = #tpu.pipeline_mode<synchronous>, transform_indices = @transform_4, window_bounds = array<i64: 1, 384>}, {pipeline_mode = #tpu.pipeline_mode<synchronous>, transform_indices = @transform_5, window_bounds = array<i64: 384, 128>}, {pipeline_mode = #tpu.pipeline_mode<synchronous>, transform_indices = @transform_6, window_bounds = array<i64: 1, 128>}, {pipeline_mode = #tpu.pipeline_mode<synchronous>, transform_indices = @transform_7, window_bounds = array<i64: 1, 128>}, {pipeline_mode = #tpu.pipeline_mode<synchronous>, transform_indices = @transform_8, window_bounds = array<i64: 1, 128>}, {transform_indices = @transform_9, window_bounds = array<i64: 8, 128>}]} {
    %c0 = arith.constant 0 : index
    %c0_0 = arith.constant 0 : index
    %0 = vector.load %arg1[%c0, %c0_0] : memref<8x32xf32, #tpu.memory_space<vmem>>, vector<8x32xf32>
    %c0_1 = arith.constant 0 : index
    %c0_2 = arith.constant 0 : index
    %1 = vector.load %arg2[%c0_1, %c0_2] : memref<32x512xf32, #tpu.memory_space<vmem>>, vector<32x512xf32>
    %cst = arith.constant dense<0.000000e+00> : vector<8x512xf32>
    %2 = tpu.matmul %0, %1, %cst {dimension_numbers = #tpu.dot_dimension_numbers<[1], [0], [0], [1], [0, 0, 1, 1], [], []>} : vector<8x32xf32>, vector<32x512xf32>, vector<8x512xf32> -> vector<8x512xf32>
    %c0_3 = arith.constant 0 : index
    %c0_4 = arith.constant 0 : index
    %3 = vector.load %arg3[%c0_3, %c0_4] : memref<1x512xf32, #tpu.memory_space<vmem>>, vector<1x512xf32>
    %4 = vector.broadcast %3 : vector<1x512xf32> to vector<8x512xf32>
    %5 = arith.addf %2, %4 : vector<8x512xf32>
    %cst_5 = arith.constant 0.000000e+00 : f32
    %6 = vector.broadcast %cst_5 : f32 to vector<8x512xf32>
    %7 = arith.maximumf %5, %6 : vector<8x512xf32>
    %c0_6 = arith.constant 0 : index
    %c0_7 = arith.constant 0 : index
    %8 = vector.load %arg4[%c0_6, %c0_7] : memref<512x384xf32, #tpu.memory_space<vmem>>, vector<512x384xf32>
    %cst_8 = arith.constant dense<0.000000e+00> : vector<8x384xf32>
    %9 = tpu.matmul %7, %8, %cst_8 {dimension_numbers = #tpu.dot_dimension_numbers<[1], [0], [0], [1], [0, 0, 1, 1], [], []>} : vector<8x512xf32>, vector<512x384xf32>, vector<8x384xf32> -> vector<8x384xf32>
    %c0_9 = arith.constant 0 : index
    %c0_10 = arith.constant 0 : index
    %10 = vector.load %arg5[%c0_9, %c0_10] : memref<1x384xf32, #tpu.memory_space<vmem>>, vector<1x384xf32>
    %11 = vector.broadcast %10 : vector<1x384xf32> to vector<8x384xf32>
    %12 = arith.addf %9, %11 : vector<8x384xf32>
    %cst_11 = arith.constant 0.000000e+00 : f32
    %13 = vector.broadcast %cst_11 : f32 to vector<8x384xf32>
    %14 = arith.maximumf %12, %13 : vector<8x384xf32>
    %c0_12 = arith.constant 0 : index
    %c0_13 = arith.constant 0 : index
    %15 = vector.load %arg6[%c0_12, %c0_13] : memref<384x128xf32, #tpu.memory_space<vmem>>, vector<384x128xf32>
    %cst_14 = arith.constant dense<0.000000e+00> : vector<8x128xf32>
    %16 = tpu.matmul %14, %15, %cst_14 {dimension_numbers = #tpu.dot_dimension_numbers<[1], [0], [0], [1], [0, 0, 1, 1], [], []>} : vector<8x384xf32>, vector<384x128xf32>, vector<8x128xf32> -> vector<8x128xf32>
    %c0_15 = arith.constant 0 : index
    %c0_16 = arith.constant 0 : index
    %17 = vector.load %arg7[%c0_15, %c0_16] : memref<1x128xf32, #tpu.memory_space<vmem>>, vector<1x128xf32>
    %18 = vector.broadcast %17 : vector<1x128xf32> to vector<8x128xf32>
    %19 = arith.addf %16, %18 : vector<8x128xf32>
    %20 = math.tanh %19 : vector<8x128xf32>
    %c0_17 = arith.constant 0 : index
    %c0_18 = arith.constant 0 : index
    %21 = vector.load %arg8[%c0_17, %c0_18] : memref<1x128xf32, #tpu.memory_space<vmem>>, vector<1x128xf32>
    %22 = vector.broadcast %21 : vector<1x128xf32> to vector<8x128xf32>
    %23 = arith.mulf %20, %22 : vector<8x128xf32>
    %c0_19 = arith.constant 0 : index
    %c0_20 = arith.constant 0 : index
    %24 = vector.load %arg9[%c0_19, %c0_20] : memref<1x128xf32, #tpu.memory_space<vmem>>, vector<1x128xf32>
    %25 = vector.broadcast %24 : vector<1x128xf32> to vector<8x128xf32>
    %26 = arith.addf %23, %25 : vector<8x128xf32>
    %c0_21 = arith.constant 0 : index
    %c0_22 = arith.constant 0 : index
    %27 = vector.load %arg10[%c0_21, %c0_22] : memref<8x128xf32, #tpu.memory_space<vmem>>, vector<8x128xf32>
    tpu.vector_store %arg10[%c0_21, %c0_22], %26 {strides = array<i32>} : memref<8x128xf32, #tpu.memory_space<vmem>>, vector<8x128xf32>,
    return
  }
  func.func @transform_0(%arg0: i32) -> (i32, i32) {
    %c0_i32 = arith.constant 0 : i32
    %c0_i32_0 = arith.constant 0 : i32
    return %arg0, %c0_i32 : i32, i32
  }
  func.func @transform_1(%arg0: i32) -> (i32, i32) {
    %c0_i32 = arith.constant 0 : i32
    %c0_i32_0 = arith.constant 0 : i32
    %c0_i32_1 = arith.constant 0 : i32
    return %c0_i32, %c0_i32_0 : i32, i32
  }
  func.func @transform_2(%arg0: i32) -> (i32, i32) {
    %c0_i32 = arith.constant 0 : i32
    %c0_i32_0 = arith.constant 0 : i32
    %c0_i32_1 = arith.constant 0 : i32
    return %c0_i32, %c0_i32_0 : i32, i32
  }
  func.func @transform_3(%arg0: i32) -> (i32, i32) {
    %c0_i32 = arith.constant 0 : i32
    %c0_i32_0 = arith.constant 0 : i32
    %c0_i32_1 = arith.constant 0 : i32
    return %c0_i32, %c0_i32_0 : i32, i32
  }
  func.func @transform_4(%arg0: i32) -> (i32, i32) {
    %c0_i32 = arith.constant 0 : i32
    %c0_i32_0 = arith.constant 0 : i32
    %c0_i32_1 = arith.constant 0 : i32
    return %c0_i32, %c0_i32_0 : i32, i32
  }
  func.func @transform_5(%arg0: i32) -> (i32, i32) {
    %c0_i32 = arith.constant 0 : i32
    %c0_i32_0 = arith.constant 0 : i32
    %c0_i32_1 = arith.constant 0 : i32
    return %c0_i32, %c0_i32_0 : i32, i32
  }
  func.func @transform_6(%arg0: i32) -> (i32, i32) {
    %c0_i32 = arith.constant 0 : i32
    %c0_i32_0 = arith.constant 0 : i32
    %c0_i32_1 = arith.constant 0 : i32
    return %c0_i32, %c0_i32_0 : i32, i32
  }
  func.func @transform_7(%arg0: i32) -> (i32, i32) {
    %c0_i32 = arith.constant 0 : i32
    %c0_i32_0 = arith.constant 0 : i32
    %c0_i32_1 = arith.constant 0 : i32
    return %c0_i32, %c0_i32_0 : i32, i32
  }
  func.func @transform_8(%arg0: i32) -> (i32, i32) {
    %c0_i32 = arith.constant 0 : i32
    %c0_i32_0 = arith.constant 0 : i32
    %c0_i32_1 = arith.constant 0 : i32
    return %c0_i32, %c0_i32_0 : i32, i32
  }
  func.func @transform_9(%arg0: i32) -> (i32, i32) {
    %c0_i32 = arith.constant 0 : i32
    %c0_i32_0 = arith.constant 0 : i32
    return %arg0, %c0_i32 : i32, i32
  }
}

</mosaic_0001>

<bundles_post_ra>
// kernel: forward.1
= control target key start
LH: loop header
LB: loop body
LE: loop exit
PB: predicated region body
PF: predicated region fallthrough
CT: control target
= control target key end

     0   :  { %14 = vsyncpa [#allocation3], 0  ;;  %s1356_s0 = inlined_call_operand.vmem [shape: f32[8,32], index: 0, kind: input, shape index: {}]   ;;  %s1357_s1 = inlined_call_operand.hbm [shape: f32[32,512], index: 1, kind: input, shape index: {}]   ;;  %s1358_s2 = inlined_call_operand.vmem [shape: f32[1,512], index: 2, kind: input, shape index: {}]   ;;  %s1359_s3 = inlined_call_operand.hbm [shape: f32[512,384], index: 3, kind: input, shape index: {}]   ;;  %s1360_s4 = inlined_call_operand.vmem [shape: f32[1,384], index: 4, kind: input, shape index: {}]   ;;  %s1361_s5 = inlined_call_operand.hbm [shape: f32[384,128], index: 5, kind: input, shape index: {}]   ;;  %s1362_s6 = inlined_call_operand.vmem [shape: f32[1,128], index: 6, kind: input, shape index: {}]   ;;  %s1363_s7 = inlined_call_operand.vmem [shape: f32[1,128], index: 7, kind: input, shape index: {}]   ;;  %s1364_s8 = inlined_call_operand.vmem [shape: f32[1,128], index: 8, kind: input, shape index: {}]   ;;  %s1365_s9 = inlined_call_operand.vmem [shape: f32[8,128], index: 9, kind: output, shape index: {}]  }
   0x1   :  { %15 = vsyncpa [#allocation5], 0  ;;  %s1214_s30 = smov [#allocation4]  }
   0x2   :  { %s37_s10 = sshll.u32 %s1214_s30, 4  ;;  %s38_s10 = int_to_ptr.vmem [resolvable:$true] %s37_s10 }
   0x3   :  { %s1158_s11 = scalar_lea.vmem %s38_s10, 24576  ;;  %p1163_p1 = scmp.lt.s32.totalorder %s38_s10, %s38_s10 }
   0x4   :  { %p1159_p0 = scmp.ne.s32.totalorder %s38_s10, %s1158_s11  ;;  %p1164_p2 = scmp.lt.s32.totalorder %s1158_s11, %s1158_s11 }
   0x6   :  { %p1165_p3 = por %p1164_p2, %p1163_p1 }
   0x8   :  { %p1166_p4 = pnand %p1165_p3, %p1159_p0 }
   0xa   :  { %1169 = shalt.err (!%p1166_p4)
}
   0xb   :  { %s1215_s12 = smov 384   ;;  %s1216_s13 = smov 24  }
   0xc   :  { %43 = dma.hbm_to_vmem [thread:$0]  %s1359_s3, 24576, %s38_s10, [#allocation5], %s1215_s12, %s1215_s12, %s1216_s13  }
   0xd   :  { %s1217_s16 = smov [#allocation2]  }
   0xe   :  { %s23_s17 = sshll.u32 %s1217_s16, 4  ;;  %s24_s17 = int_to_ptr.vmem [resolvable:$true] %s23_s17 }
   0xf   :  { %s1178_s18 = scalar_lea.vmem %s24_s17, 2048  ;;  %p1183_p6 = scmp.lt.s32.totalorder %s24_s17, %s24_s17 }
  0x10   :  { %p1179_p5 = scmp.ne.s32.totalorder %s24_s17, %s1178_s18  ;;  %p1184_p7 = scmp.lt.s32.totalorder %s1178_s18, %s1178_s18 }
  0x12   :  { %p1185_p8 = por %p1184_p7, %p1183_p6 }
  0x14   :  { %p1186_p9 = pnand %p1185_p8, %p1179_p5 }
  0x16   :  { %1189 = shalt.err (!%p1186_p9)
}
  0x17   :  { %s1218_s19 = smov 512   ;;  %s1219_s20 = smov 32  }
  0x18   :  { %29 = dma.hbm_to_vmem [thread:$0]  %s1357_s1, 2048, %s24_s17, [#allocation3], %s1218_s19, %s1218_s19, %s1219_s20  }
  0x19   :  { %s1220_s23 = smov [#allocation6]  }
  0x1a   :  { %s51_s24 = sshll.u32 %s1220_s23, 4  ;;  %s52_s24 = int_to_ptr.vmem [resolvable:$true] %s51_s24 }
  0x1b   :  { %s1198_s3 = scalar_lea.vmem %s52_s24, 6144  ;;  %p1203_p11 = scmp.lt.s32.totalorder %s52_s24, %s52_s24 }
  0x1c   :  { %p1199_p10 = scmp.ne.s32.totalorder %s52_s24, %s1198_s3  ;;  %p1204_p12 = scmp.lt.s32.totalorder %s1198_s3, %s1198_s3 }
  0x1e   :  { %p1205_p13 = por %p1204_p12, %p1203_p11 }
  0x20   :  { %p1206_p0 = pnand %p1205_p13, %p1199_p10 }
  0x22   :  { %1209 = shalt.err (!%p1206_p0)
}
  0x23   :  { %s1221_s25 = smov 128   ;;  %s1222_s26 = smov 8  }
  0x24   :  { %57 = dma.hbm_to_vmem [thread:$0]  %s1361_s5, 6144, %s52_s24, [#allocation5], %s1221_s25, %s1221_s25, %s1222_s26  }
  0x25   :  { %1210 = dma.done.wait [#allocation3], 2048  }
  0x26   :  { %1211 = vsyncadd [#allocation3], 4294965248 }
  0x27   :  { %1212 = dma.done.wait [#allocation5], 30720  }
  0x28   :  { %1213 = vsyncadd [#allocation5], 4294936576  ;;  %v1223_v0 = vmov 0.0   ;;  %v87_v1 = vld [vmem:[#allocation2 + $0x68] sm:$0xff]  ;;  %v89_v2 = vld [vmem:[#allocation2 + $0x78] sm:$0xff]  ;;  %vm112_vm0 = vcmask 261120  }
  0x29   :  { %180 = vmatprep.mubr.f32.mxu0 %v1223_v0  ;;  %251 = vmatprep.mubr.f32.mxu1 %v1223_v0  ;;  %v86_v3 = vld [vmem:[#allocation2 + $0x60] sm:$0xff]  ;;  %v88_v4 = vld [vmem:[#allocation2 + $0x70] sm:$0xff]  ;;  %v83_v5 = vld [vmem:[#allocation2 + $0x48] sm:$0xff]  ;;  %vm1224_vm1 = vmmov 0  }
  0x2a   :  { %140 = vmatprep.subr.mxu0 %v87_v1  ;;  %211 = vmatprep.subr.mxu1 %v89_v2  ;;  %v85_v6 = vld [vmem:[#allocation2 + $0x58] sm:$0xff]  ;;  %v82_v7 = vld [vmem:[#allocation2 + $0x40] sm:$0xff]  ;;  %v84_v8 = vld [vmem:[#allocation2 + $0x50] sm:$0xff] }
  0x2b   :  { %141 = vmatpush1.msra.mxu0 %v86_v3  ;;  %212 = vmatpush1.msra.mxu1 %v88_v4  ;;  %v79_v9 = vld [vmem:[#allocation2 + $0x28] sm:$0xff]  ;;  %v81_v10 = vld [vmem:[#allocation2 + $0x38] sm:$0xff]  ;;  %v78_v11 = vld [vmem:[#allocation2 + $0x20] sm:$0xff] }
  0x2c   :  { %142 = vmatprep.subr.mxu0 %v83_v5  ;;  %213 = vmatprep.subr.mxu1 %v85_v6  ;;  %v80_v12 = vld [vmem:[#allocation2 + $0x30] sm:$0xff]  ;;  %v75_v13 = vld [vmem:[#allocation2 + $0x8] sm:$0xff]  ;;  %v77_v14 = vld [vmem:[#allocation2 + $0x18] sm:$0xff] }
  0x2d   :  { %143 = vmatpush1.msra.mxu0 %v82_v7  ;;  %214 = vmatpush1.msra.mxu1 %v84_v8  ;;  %v74_v15 = vld [vmem:[#allocation2] sm:$0xff]  ;;  %v76_v16 = vld [vmem:[#allocation2 + $0x10] sm:$0xff]  ;;  %v307_v20 = vld [vmem:[#allocation4 + $0x168] sm:$0xff] }
  0x2e   :  { %144 = vmatprep.subr.mxu0 %v79_v9  ;;  %215 = vmatprep.subr.mxu1 %v81_v10  ;;  %v73_v17 = vld [vmem:[%s1356_s0] sm:$0xff]  ;;  %v308_v18 = vld [vmem:[#allocation4 + $0x170] sm:$0xff]  ;;  %v403_v21 = vld [vmem:[#allocation4 + $0x468] sm:$0xff] }
  0x2f   :  { %145 = vmatpush1.msra.mxu0 %v78_v11  ;;  %216 = vmatpush1.msra.mxu1 %v80_v12  ;;  %v404_v19 = vld [vmem:[#allocation4 + $0x470] sm:$0xff]  ;;  %v305_v22 = vld [vmem:[#allocation4 + $0x158] sm:$0xff]  ;;  %v302_v26 = vld [vmem:[#allocation4 + $0x140] sm:$0xff] }
  0x30   :  { %146 = vmatprep.subr.mxu0 %v75_v13  ;;  %217 = vmatprep.subr.mxu1 %v77_v14  ;;  %v401_v23 = vld [vmem:[#allocation4 + $0x458] sm:$0xff]  ;;  %v304_v24 = vld [vmem:[#allocation4 + $0x150] sm:$0xff]  ;;  %v398_v27 = vld [vmem:[#allocation4 + $0x440] sm:$0xff] }
  0x31   :  { %147 = vmatpush1.msra.mxu0 %v74_v15  ;;  %218 = vmatpush1.msra.mxu1 %v76_v16  ;;  %v400_v25 = vld [vmem:[#allocation4 + $0x450] sm:$0xff]  ;;  %v301_v28 = vld [vmem:[#allocation4 + $0x138] sm:$0xff]  ;;  %v299_v30 = vld [vmem:[#allocation4 + $0x128] sm:$0xff] }
  0x32   :  { %975 = vmatmul.mubr.msk.f32.vlgmr.msra.gmra.mxu0 %vm112_vm0, %v73_v17  ;;  %976 = vmatmul.mubr.msk.f32.vlgmr.msra.gmra.mxu1 %vm112_vm0, %v73_v17  ;;  %v397_v29 = vld [vmem:[#allocation4 + $0x438] sm:$0xff]  ;;  %v395_v31 = vld [vmem:[#allocation4 + $0x428] sm:$0xff]  ;;  %v298_v32 = vld [vmem:[#allocation4 + $0x120] sm:$0xff] }
  0x33   :  { %471 = vmatprep.subr.mxu0 %v308_v18  ;;  %542 = vmatprep.subr.mxu1 %v404_v19  ;;  %v394_v33 = vld [vmem:[#allocation4 + $0x420] sm:$0xff]  ;;  %v296_v34 = vld [vmem:[#allocation4 + $0x110] sm:$0xff]  ;;  %v295_v36 = vld [vmem:[#allocation4 + $0x108] sm:$0xff] }
  0x34   :  { %472 = vmatpush1.msra.mxu0 %v307_v20  ;;  %543 = vmatpush1.msra.mxu1 %v403_v21  ;;  %v392_v35 = vld [vmem:[#allocation4 + $0x410] sm:$0xff]  ;;  %v391_v37 = vld [vmem:[#allocation4 + $0x408] sm:$0xff]  ;;  %v293_v38 = vld [vmem:[#allocation4 + $0xf8] sm:$0xff] }
  0x35   :  { %473 = vmatprep.subr.mxu0 %v305_v22  ;;  %544 = vmatprep.subr.mxu1 %v401_v23  ;;  %v389_v39 = vld [vmem:[#allocation4 + $0x3f8] sm:$0xff]  ;;  %v292_v40 = vld [vmem:[#allocation4 + $0xf0] sm:$0xff]  ;;  %v290_v42 = vld [vmem:[#allocation4 + $0xe0] sm:$0xff] }
  0x36   :  { %474 = vmatpush1.msra.mxu0 %v304_v24  ;;  %545 = vmatpush1.msra.mxu1 %v400_v25  ;;  %v388_v41 = vld [vmem:[#allocation4 + $0x3f0] sm:$0xff]  ;;  %v386_v43 = vld [vmem:[#allocation4 + $0x3e0] sm:$0xff]  ;;  %v289_v44 = vld [vmem:[#allocation4 + $0xd8] sm:$0xff] }
  0x37   :  { %475 = vmatprep.subr.mxu0 %v302_v26  ;;  %546 = vmatprep.subr.mxu1 %v398_v27  ;;  %v385_v45 = vld [vmem:[#allocation4 + $0x3d8] sm:$0xff]  ;;  %v287_v46 = vld [vmem:[#allocation4 + $0xc8] sm:$0xff]  ;;  %v286_v48 = vld [vmem:[#allocation4 + $0xc0] sm:$0xff] }
  0x38   :  { %476 = vmatpush1.msra.mxu0 %v301_v28  ;;  %547 = vmatpush1.msra.mxu1 %v397_v29  ;;  %v383_v47 = vld [vmem:[#allocation4 + $0x3c8] sm:$0xff]  ;;  %v382_v49 = vld [vmem:[#allocation4 + $0x3c0] sm:$0xff]  ;;  %v284_v50 = vld [vmem:[#allocation4 + $0xb0] sm:$0xff] }
  0x39   :  { %477 = vmatprep.subr.mxu0 %v299_v30  ;;  %548 = vmatprep.subr.mxu1 %v395_v31  ;;  %v380_v51 = vld [vmem:[#allocation4 + $0x3b0] sm:$0xff]  ;;  %v283_v52 = vld [vmem:[#allocation4 + $0xa8] sm:$0xff]  ;;  %v281_v54 = vld [vmem:[#allocation4 + $0x98] sm:$0xff] }
  0x3a   :  { %478 = vmatpush1.msra.mxu0 %v298_v32  ;;  %549 = vmatpush1.msra.mxu1 %v394_v33  ;;  %v379_v53 = vld [vmem:[#allocation4 + $0x3a8] sm:$0xff]  ;;  %v377_v55 = vld [vmem:[#allocation4 + $0x398] sm:$0xff]  ;;  %v280_v56 = vld [vmem:[#allocation4 + $0x90] sm:$0xff] }
  0x3b   :  { %479 = vmatprep.subr.mxu0 %v296_v34  ;;  %550 = vmatprep.subr.mxu1 %v392_v35  ;;  %v376_v57 = vld [vmem:[#allocation4 + $0x390] sm:$0xff]  ;;  %v278_v58 = vld [vmem:[#allocation4 + $0x80] sm:$0xff]  ;;  %v277_v60 = vld [vmem:[#allocation4 + $0x78] sm:$0xff] }
  0x3c   :  { %480 = vmatpush1.msra.mxu0 %v295_v36  ;;  %551 = vmatpush1.msra.mxu1 %v391_v37  ;;  %v374_v59 = vld [vmem:[#allocation4 + $0x380] sm:$0xff]  ;;  %v373_v61 = vld [vmem:[#allocation4 + $0x378] sm:$0xff]  ;;  %v275_v62 = vld [vmem:[#allocation4 + $0x68] sm:$0xff] }
  0x3d   :  { %481 = vmatprep.subr.mxu0 %v293_v38  ;;  %552 = vmatprep.subr.mxu1 %v389_v39  ;;  %v371_v63 = vld [vmem:[#allocation4 + $0x368] sm:$0xff]  ;;  %v274_v1 = vld [vmem:[#allocation4 + $0x60] sm:$0xff]  ;;  %v272_v3 = vld [vmem:[#allocation4 + $0x50] sm:$0xff] }
  0x3e   :  { %482 = vmatpush1.msra.mxu0 %v292_v40  ;;  %553 = vmatpush1.msra.mxu1 %v388_v41  ;;  %v370_v2 = vld [vmem:[#allocation4 + $0x360] sm:$0xff]  ;;  %v368_v4 = vld [vmem:[#allocation4 + $0x350] sm:$0xff]  ;;  %v271_v5 = vld [vmem:[#allocation4 + $0x48] sm:$0xff] }
  0x3f   :  { %483 = vmatprep.subr.mxu0 %v290_v42  ;;  %554 = vmatprep.subr.mxu1 %v386_v43  ;;  %v367_v6 = vld [vmem:[#allocation4 + $0x348] sm:$0xff]  ;;  %v269_v7 = vld [vmem:[#allocation4 + $0x38] sm:$0xff]  ;;  %v268_v9 = vld [vmem:[#allocation4 + $0x30] sm:$0xff] }
  0x40   :  { %484 = vmatpush1.msra.mxu0 %v289_v44  ;;  %555 = vmatpush1.msra.mxu1 %v385_v45  ;;  %v365_v8 = vld [vmem:[#allocation4 + $0x338] sm:$0xff]  ;;  %v364_v10 = vld [vmem:[#allocation4 + $0x330] sm:$0xff]  ;;  %v266_v11 = vld [vmem:[#allocation4 + $0x20] sm:$0xff] }
  0x41   :  { %485 = vmatprep.subr.mxu0 %v287_v46  ;;  %556 = vmatprep.subr.mxu1 %v383_v47  ;;  %v362_v12 = vld [vmem:[#allocation4 + $0x320] sm:$0xff]  ;;  %v265_v13 = vld [vmem:[#allocation4 + $0x18] sm:$0xff]  ;;  %v263_v15 = vld [vmem:[#allocation4 + $0x8] sm:$0xff] }
  0x42   :  { %486 = vmatpush1.msra.mxu0 %v286_v48  ;;  %557 = vmatpush1.msra.mxu1 %v382_v49  ;;  %v361_v14 = vld [vmem:[#allocation4 + $0x318] sm:$0xff]  ;;  %v359_v16 = vld [vmem:[#allocation4 + $0x308] sm:$0xff]  ;;  %v262_v17 = vld [vmem:[#allocation4] sm:$0xff] }
  0x43   :  { %487 = vmatprep.subr.mxu0 %v284_v50  ;;  %558 = vmatprep.subr.mxu1 %v380_v51  ;;  %v358_v18 = vld [vmem:[#allocation4 + $0x300] sm:$0xff]  ;;  %v356_v19 = vld [vmem:[#allocation4 + $0x2f0] sm:$0xff]  ;;  %v355_v21 = vld [vmem:[#allocation4 + $0x2e8] sm:$0xff] }
  0x44   :  { %488 = vmatpush1.msra.mxu0 %v283_v52  ;;  %559 = vmatpush1.msra.mxu1 %v379_v53  ;;  %v452_v20 = vld [vmem:[#allocation4 + $0x5f0] sm:$0xff]  ;;  %v451_v22 = vld [vmem:[#allocation4 + $0x5e8] sm:$0xff]  ;;  %v353_v23 = vld [vmem:[#allocation4 + $0x2d8] sm:$0xff] }
  0x45   :  { %489 = vmatprep.subr.mxu0 %v281_v54  ;;  %560 = vmatprep.subr.mxu1 %v377_v55  ;;  %v449_v24 = vld [vmem:[#allocation4 + $0x5d8] sm:$0xff]  ;;  %v352_v25 = vld [vmem:[#allocation4 + $0x2d0] sm:$0xff]  ;;  %v350_v27 = vld [vmem:[#allocation4 + $0x2c0] sm:$0xff] }
  0x46   :  { %490 = vmatpush1.msra.mxu0 %v280_v56  ;;  %561 = vmatpush1.msra.mxu1 %v376_v57  ;;  %v448_v26 = vld [vmem:[#allocation4 + $0x5d0] sm:$0xff]  ;;  %v446_v28 = vld [vmem:[#allocation4 + $0x5c0] sm:$0xff]  ;;  %v349_v29 = vld [vmem:[#allocation4 + $0x2b8] sm:$0xff] }
  0x47   :  { %491 = vmatprep.subr.mxu0 %v278_v58  ;;  %562 = vmatprep.subr.mxu1 %v374_v59  ;;  %v445_v30 = vld [vmem:[#allocation4 + $0x5b8] sm:$0xff]  ;;  %v347_v31 = vld [vmem:[#allocation4 + $0x2a8] sm:$0xff]  ;;  %v346_v33 = vld [vmem:[#allocation4 + $0x2a0] sm:$0xff] }
  0x48   :  { %492 = vmatpush1.msra.mxu0 %v277_v60  ;;  %563 = vmatpush1.msra.mxu1 %v373_v61  ;;  %v443_v32 = vld [vmem:[#allocation4 + $0x5a8] sm:$0xff]  ;;  %v442_v34 = vld [vmem:[#allocation4 + $0x5a0] sm:$0xff]  ;;  %v344_v35 = vld [vmem:[#allocation4 + $0x290] sm:$0xff] }
  0x49   :  { %493 = vmatprep.subr.mxu0 %v275_v62  ;;  %564 = vmatprep.subr.mxu1 %v371_v63  ;;  %v440_v36 = vld [vmem:[#allocation4 + $0x590] sm:$0xff]  ;;  %v343_v37 = vld [vmem:[#allocation4 + $0x288] sm:$0xff]  ;;  %v341_v39 = vld [vmem:[#allocation4 + $0x278] sm:$0xff] }
  0x4a   :  { %494 = vmatpush1.msra.mxu0 %v274_v1  ;;  %565 = vmatpush1.msra.mxu1 %v370_v2  ;;  %v439_v38 = vld [vmem:[#allocation4 + $0x588] sm:$0xff]  ;;  %v437_v40 = vld [vmem:[#allocation4 + $0x578] sm:$0xff]  ;;  %v340_v41 = vld [vmem:[#allocation4 + $0x270] sm:$0xff] }
  0x4b   :  { %495 = vmatprep.subr.mxu0 %v272_v3  ;;  %566 = vmatprep.subr.mxu1 %v368_v4  ;;  %v436_v42 = vld [vmem:[#allocation4 + $0x570] sm:$0xff]  ;;  %v338_v43 = vld [vmem:[#allocation4 + $0x260] sm:$0xff]  ;;  %v337_v45 = vld [vmem:[#allocation4 + $0x258] sm:$0xff] }
  0x4c   :  { %496 = vmatpush1.msra.mxu0 %v271_v5  ;;  %567 = vmatpush1.msra.mxu1 %v367_v6  ;;  %v434_v44 = vld [vmem:[#allocation4 + $0x560] sm:$0xff]  ;;  %v433_v46 = vld [vmem:[#allocation4 + $0x558] sm:$0xff]  ;;  %v335_v47 = vld [vmem:[#allocation4 + $0x248] sm:$0xff] }
  0x4d   :  { %497 = vmatprep.subr.mxu0 %v269_v7  ;;  %568 = vmatprep.subr.mxu1 %v365_v8  ;;  %v431_v48 = vld [vmem:[#allocation4 + $0x548] sm:$0xff]  ;;  %v334_v49 = vld [vmem:[#allocation4 + $0x240] sm:$0xff]  ;;  %v332_v51 = vld [vmem:[#allocation4 + $0x230] sm:$0xff] }
  0x4e   :  { %498 = vmatpush1.msra.mxu0 %v268_v9  ;;  %569 = vmatpush1.msra.mxu1 %v364_v10  ;;  %v430_v50 = vld [vmem:[#allocation4 + $0x540] sm:$0xff]  ;;  %v428_v52 = vld [vmem:[#allocation4 + $0x530] sm:$0xff]  ;;  %v331_v53 = vld [vmem:[#allocation4 + $0x228] sm:$0xff] }
  0x4f   :  { %499 = vmatprep.subr.mxu0 %v266_v11  ;;  %570 = vmatprep.subr.mxu1 %v362_v12  ;;  %v427_v54 = vld [vmem:[#allocation4 + $0x528] sm:$0xff]  ;;  %v329_v55 = vld [vmem:[#allocation4 + $0x218] sm:$0xff]  ;;  %v328_v57 = vld [vmem:[#allocation4 + $0x210] sm:$0xff] }
  0x50   :  { %500 = vmatpush1.msra.mxu0 %v265_v13  ;;  %571 = vmatpush1.msra.mxu1 %v361_v14  ;;  %v425_v56 = vld [vmem:[#allocation4 + $0x518] sm:$0xff]  ;;  %v424_v58 = vld [vmem:[#allocation4 + $0x510] sm:$0xff]  ;;  %v326_v59 = vld [vmem:[#allocation4 + $0x200] sm:$0xff] }
  0x51   :  { %501 = vmatprep.subr.mxu0 %v263_v15  ;;  %572 = vmatprep.subr.mxu1 %v359_v16  ;;  %v422_v60 = vld [vmem:[#allocation4 + $0x500] sm:$0xff]  ;;  %v325_v61 = vld [vmem:[#allocation4 + $0x1f8] sm:$0xff]  ;;  %v323_v63 = vld [vmem:[#allocation4 + $0x1e8] sm:$0xff] }
  0x52   :  { %502 = vmatpush1.msra.mxu0 %v262_v17  ;;  %573 = vmatpush1.msra.mxu1 %v358_v18  ;;  %v421_v62 = vld [vmem:[#allocation4 + $0x4f8] sm:$0xff]  ;;  %v419_v1 = vld [vmem:[#allocation4 + $0x4e8] sm:$0xff]  ;;  %v322_v2 = vld [vmem:[#allocation4 + $0x1e0] sm:$0xff] }
  0x53   :  { %503 = vmatprep.subr.mxu0 %v356_v19  ;;  %574 = vmatprep.subr.mxu1 %v452_v20  ;;  %v418_v3 = vld [vmem:[#allocation4 + $0x4e0] sm:$0xff]  ;;  %v320_v4 = vld [vmem:[#allocation4 + $0x1d0] sm:$0xff]  ;;  %v319_v6 = vld [vmem:[#allocation4 + $0x1c8] sm:$0xff] }
  0x54   :  { %504 = vmatpush2.msra.mxu0 %v355_v21  ;;  %575 = vmatpush2.msra.mxu1 %v451_v22  ;;  %v416_v5 = vld [vmem:[#allocation4 + $0x4d0] sm:$0xff]  ;;  %v415_v7 = vld [vmem:[#allocation4 + $0x4c8] sm:$0xff]  ;;  %v317_v8 = vld [vmem:[#allocation4 + $0x1b8] sm:$0xff]  ;;  %v92_v22 = vlaneseq }
  0x55   :  { %505 = vmatprep.subr.mxu0 %v353_v23  ;;  %576 = vmatprep.subr.mxu1 %v449_v24  ;;  %v413_v9 = vld [vmem:[#allocation4 + $0x4b8] sm:$0xff]  ;;  %v316_v10 = vld [vmem:[#allocation4 + $0x1b0] sm:$0xff]  ;;  %v314_v12 = vld [vmem:[#allocation4 + $0x1a0] sm:$0xff] }
  0x56   :  { %506 = vmatpush2.msra.mxu0 %v352_v25  ;;  %577 = vmatpush2.msra.mxu1 %v448_v26  ;;  %v412_v11 = vld [vmem:[#allocation4 + $0x4b0] sm:$0xff]  ;;  %v410_v13 = vld [vmem:[#allocation4 + $0x4a0] sm:$0xff]  ;;  %v313_v14 = vld [vmem:[#allocation4 + $0x198] sm:$0xff]  ;;  %v1289_v23 = vshrl.u32 %v92_v22, 7 }
  0x57   :  { %507 = vmatprep.subr.mxu0 %v350_v27  ;;  %578 = vmatprep.subr.mxu1 %v446_v28  ;;  %v409_v15 = vld [vmem:[#allocation4 + $0x498] sm:$0xff]  ;;  %v311_v16 = vld [vmem:[#allocation4 + $0x188] sm:$0xff]  ;;  %v310_v18 = vld [vmem:[#allocation4 + $0x180] sm:$0xff] }
  0x58   :  { %508 = vmatpush2.msra.mxu0 %v349_v29  ;;  %579 = vmatpush2.msra.mxu1 %v445_v30  ;;  %v407_v17 = vld [vmem:[#allocation4 + $0x488] sm:$0xff]  ;;  %v406_v19 = vld [vmem:[#allocation4 + $0x480] sm:$0xff]  ;;  %v357_v20 = vld [vmem:[#allocation4 + $0x2f8] sm:$0xff]  ;;  %v102_v24 = vsub.s32 2, %v1289_v23  ;;  %v94_v25 = vsub.s32 0, %v1289_v23  ;;  %v98_v27 = vsub.s32 1, %v1289_v23 }
  0x59   :  { %509 = vmatprep.subr.mxu0 %v347_v31  ;;  %580 = vmatprep.subr.mxu1 %v443_v32  ;;  %v453_v21 = vld [vmem:[#allocation4 + $0x5f8] sm:$0xff]  ;;  %v90_v26 = vld [vmem:[%s1358_s2] sm:$0xf]  ;;  %v106_v28 = vsub.s32 3, %v1289_v23  ;;  %v279_v22 = vld [vmem:[#allocation4 + $0x88] sm:$0xff] }
  0x5a   :  { %510 = vmatpush2.msra.mxu0 %v346_v33  ;;  %581 = vmatpush2.msra.mxu1 %v442_v34  ;;  %v103_v29 = vrot.slane %v90_v26, %v102_v24  ;;  %v95_v30 = vrot.slane %v90_v26, %v94_v25  ;;  %v99_v31 = vrot.slane %v90_v26, %v98_v27 }
  0x5b   :  { %511 = vmatprep.subr.mxu0 %v344_v35  ;;  %582 = vmatprep.subr.mxu1 %v440_v36  ;;  %v107_v32 = vrot.slane %v90_v26, %v106_v28  ;;  %v375_v26 = vld [vmem:[#allocation4 + $0x388] sm:$0xff]  ;;  %v324_v28 = vld [vmem:[#allocation4 + $0x1f0] sm:$0xff] }
  0x5c   :  { %512 = vmatpush2.msra.mxu0 %v343_v37  ;;  %583 = vmatpush2.msra.mxu1 %v439_v38 }
  0x5d   :  { %513 = vmatprep.subr.mxu0 %v341_v39  ;;  %584 = vmatprep.subr.mxu1 %v437_v40 }
  0x5e   :  { %514 = vmatpush2.msra.mxu0 %v340_v41  ;;  %585 = vmatpush2.msra.mxu1 %v436_v42 }
  0x5f   :  { %515 = vmatprep.subr.mxu0 %v338_v43  ;;  %586 = vmatprep.subr.mxu1 %v434_v44 }
  0x60   :  { %516 = vmatpush2.msra.mxu0 %v337_v45  ;;  %587 = vmatpush2.msra.mxu1 %v433_v46  ;;  %v309_v45 = vld [vmem:[#allocation4 + $0x178] sm:$0xff] }
  0x61   :  { %517 = vmatprep.subr.mxu0 %v335_v47  ;;  %588 = vmatprep.subr.mxu1 %v431_v48  ;;  %v405_v46 = vld [vmem:[#allocation4 + $0x478] sm:$0xff]  ;;  %v354_v47 = vld [vmem:[#allocation4 + $0x2e0] sm:$0xff] }
  0x62   :  { %518 = vmatpush2.msra.mxu0 %v334_v49  ;;  %589 = vmatpush2.msra.mxu1 %v430_v50  ;;  %v450_v48 = vld [vmem:[#allocation4 + $0x5e0] sm:$0xff] }
  0x63   :  { %519 = vmatprep.subr.mxu0 %v332_v51  ;;  %590 = vmatprep.subr.mxu1 %v428_v52  ;;  %v306_v49 = vld [vmem:[#allocation4 + $0x160] sm:$0xff]  ;;  %v351_v51 = vld [vmem:[#allocation4 + $0x2c8] sm:$0xff] }
  0x64   :  { %520 = vmatpush2.msra.mxu0 %v331_v53  ;;  %591 = vmatpush2.msra.mxu1 %v427_v54  ;;  %v402_v50 = vld [vmem:[#allocation4 + $0x460] sm:$0xff]  ;;  %v447_v52 = vld [vmem:[#allocation4 + $0x5c8] sm:$0xff] }
  0x65   :  { %521 = vmatprep.subr.mxu0 %v329_v55  ;;  %592 = vmatprep.subr.mxu1 %v425_v56  ;;  %v303_v53 = vld [vmem:[#allocation4 + $0x148] sm:$0xff]  ;;  %v348_v55 = vld [vmem:[#allocation4 + $0x2b0] sm:$0xff] }
  0x66   :  { %522 = vmatpush2.msra.mxu0 %v328_v57  ;;  %593 = vmatpush2.msra.mxu1 %v424_v58  ;;  %v399_v54 = vld [vmem:[#allocation4 + $0x448] sm:$0xff]  ;;  %v444_v56 = vld [vmem:[#allocation4 + $0x5b0] sm:$0xff] }
  0x67   :  { %523 = vmatprep.subr.mxu0 %v326_v59  ;;  %594 = vmatprep.subr.mxu1 %v422_v60  ;;  %v300_v57 = vld [vmem:[#allocation4 + $0x130] sm:$0xff]  ;;  %v345_v59 = vld [vmem:[#allocation4 + $0x298] sm:$0xff] }
  0x68   :  { %524 = vmatpush2.msra.mxu0 %v325_v61  ;;  %595 = vmatpush2.msra.mxu1 %v421_v62  ;;  %v396_v58 = vld [vmem:[#allocation4 + $0x430] sm:$0xff]  ;;  %v441_v60 = vld [vmem:[#allocation4 + $0x598] sm:$0xff] }
  0x69   :  { %525 = vmatprep.subr.mxu0 %v323_v63  ;;  %596 = vmatprep.subr.mxu1 %v419_v1  ;;  %v297_v61 = vld [vmem:[#allocation4 + $0x118] sm:$0xff]  ;;  %v342_v63 = vld [vmem:[#allocation4 + $0x280] sm:$0xff] }
  0x6a   :  { %526 = vmatpush2.msra.mxu0 %v322_v2  ;;  %597 = vmatpush2.msra.mxu1 %v418_v3  ;;  %v393_v62 = vld [vmem:[#allocation4 + $0x418] sm:$0xff]  ;;  %v438_v1 = vld [vmem:[#allocation4 + $0x580] sm:$0xff] }
  0x6b   :  { %527 = vmatprep.subr.mxu0 %v320_v4  ;;  %598 = vmatprep.subr.mxu1 %v416_v5  ;;  %v294_v2 = vld [vmem:[#allocation4 + $0x100] sm:$0xff]  ;;  %v339_v4 = vld [vmem:[#allocation4 + $0x268] sm:$0xff] }
  0x6c   :  { %528 = vmatpush2.msra.mxu0 %v319_v6  ;;  %599 = vmatpush2.msra.mxu1 %v415_v7  ;;  %v390_v3 = vld [vmem:[#allocation4 + $0x400] sm:$0xff]  ;;  %v435_v5 = vld [vmem:[#allocation4 + $0x568] sm:$0xff] }
  0x6d   :  { %529 = vmatprep.subr.mxu0 %v317_v8  ;;  %600 = vmatprep.subr.mxu1 %v413_v9  ;;  %v291_v6 = vld [vmem:[#allocation4 + $0xe8] sm:$0xff]  ;;  %v336_v8 = vld [vmem:[#allocation4 + $0x250] sm:$0xff] }
  0x6e   :  { %530 = vmatpush2.msra.mxu0 %v316_v10  ;;  %601 = vmatpush2.msra.mxu1 %v412_v11  ;;  %v387_v7 = vld [vmem:[#allocation4 + $0x3e8] sm:$0xff]  ;;  %v432_v9 = vld [vmem:[#allocation4 + $0x550] sm:$0xff] }
  0x6f   :  { %531 = vmatprep.subr.mxu0 %v314_v12  ;;  %602 = vmatprep.subr.mxu1 %v410_v13  ;;  %v288_v10 = vld [vmem:[#allocation4 + $0xd0] sm:$0xff]  ;;  %v333_v12 = vld [vmem:[#allocation4 + $0x238] sm:$0xff] }
  0x70   :  { %532 = vmatpush2.msra.mxu0 %v313_v14  ;;  %603 = vmatpush2.msra.mxu1 %v409_v15  ;;  %v384_v11 = vld [vmem:[#allocation4 + $0x3d0] sm:$0xff]  ;;  %v429_v13 = vld [vmem:[#allocation4 + $0x538] sm:$0xff] }
  0x71   :  { %533 = vmatprep.subr.mxu0 %v311_v16  ;;  %604 = vmatprep.subr.mxu1 %v407_v17  ;;  %v285_v14 = vld [vmem:[#allocation4 + $0xb8] sm:$0xff]  ;;  %v330_v16 = vld [vmem:[#allocation4 + $0x220] sm:$0xff] }
  0x72   :  { %534 = vmatpush2.msra.mxu0 %v310_v18  ;;  %605 = vmatpush2.msra.mxu1 %v406_v19  ;;  %v381_v15 = vld [vmem:[#allocation4 + $0x3b8] sm:$0xff]  ;;  %v426_v17 = vld [vmem:[#allocation4 + $0x520] sm:$0xff] }
  0x73   :  { %980 = vmatprep.subr.mxu0 %v357_v20  ;;  %1015 = vmatprep.subr.mxu1 %v453_v21  ;;  %v282_v18 = vld [vmem:[#allocation4 + $0xa0] sm:$0xff]  ;;  %v327_v20 = vld [vmem:[#allocation4 + $0x208] sm:$0xff] }
  0x74   :  { %v378_v19 = vld [vmem:[#allocation4 + $0x3a0] sm:$0xff]  ;;  %v423_v21 = vld [vmem:[#allocation4 + $0x508] sm:$0xff] }
  0xf2   :  { %v182_v33 = vpop.f32.mrf.mxu0  ;;  %v253_v34 = vpop.f32.mrf.mxu1 }
  0xf3   :  { %v1304_v35 = vadd.f32 %v253_v34, %v103_v29  ;;  %v1306_v36 = vadd.f32 %v182_v33, %v95_v30  ;;  %v420_v29 = vld [vmem:[#allocation4 + $0x4f0] sm:$0xff]  ;;  %v417_v33 = vld [vmem:[#allocation4 + $0x4d8] sm:$0xff] }
  0xf4   :  { %v184_v37 = vpop.f32.mrf.mxu0  ;;  %v255_v38 = vpop.f32.mrf.mxu1  ;;  %v276_v30 = vld [vmem:[#allocation4 + $0x70] sm:$0xff]  ;;  %v273_v34 = vld [vmem:[#allocation4 + $0x58] sm:$0xff] }
  0xf5   :  { %v185_v39 = vadd.f32 %v184_v37, %v99_v31  ;;  %v256_v40 = vadd.f32 %v255_v38, %v107_v32  ;;  %v260_v41 = vmax.f32 %v1304_v35, 0.0  ;;  %v258_v44 = vmax.f32 %v1306_v36, 0.0  ;;  %v372_v31 = vld [vmem:[#allocation4 + $0x370] sm:$0xff]  ;;  %v321_v32 = vld [vmem:[#allocation4 + $0x1d8] sm:$0xff]  ;;  %v318_v38 = vld [vmem:[#allocation4 + $0x1c0] sm:$0xff] }
  0xf6   :  { %v369_v37 = vld [vmem:[#allocation4 + $0x358] sm:$0xff]  ;;  %v782_v35 = vld [vmem:[#allocation6 + $0xd0] sm:$0xff] }
  0xf7   :  { %v259_v42 = vmax.f32 %v185_v39, 0.0  ;;  %v261_v43 = vmax.f32 %v256_v40, 0.0  ;;  %v414_v39 = vld [vmem:[#allocation4 + $0x4c0] sm:$0xff]  ;;  %v767_v36 = vld [vmem:[#allocation6 + $0x58] sm:$0xff] }
  0xf8   :  { %v270_v40 = vld [vmem:[#allocation4 + $0x40] sm:$0xff] }
  0xf9   :  { %535 = vmatprep.mubr.f32.mxu0 %v259_v42  ;;  %606 = vmatprep.mubr.f32.mxu1 %v261_v43 }
  0xfa   :  { %536 = vmatmul.mubr.f32.vlgmr.msra.gmra.mxu0 %v258_v44  ;;  %607 = vmatmul.mubr.f32.vlgmr.msra.gmra.mxu1 %v260_v41 }
  0xfb   :  { %981 = vmatpush3.msra.mxu0 %v309_v45  ;;  %1016 = vmatpush3.msra.mxu1 %v405_v46  ;;  %v411_v45 = vld [vmem:[#allocation4 + $0x4a8] sm:$0xff] }
  0xfc   :  { %982 = vmatprep.subr.mxu0 %v354_v47  ;;  %677 = vmatprep.mubr.f32.mxu0 %v259_v42  ;;  %v366_v42 = vld [vmem:[#allocation4 + $0x340] sm:$0xff]  ;;  %v267_v46 = vld [vmem:[#allocation4 + $0x28] sm:$0xff] }
  0xfd   :  { %1017 = vmatprep.subr.mxu1 %v450_v48  ;;  %747 = vmatprep.mubr.f32.mxu1 %v261_v43  ;;  %v315_v43 = vld [vmem:[#allocation4 + $0x1a8] sm:$0xff]  ;;  %v312_v48 = vld [vmem:[#allocation4 + $0x190] sm:$0xff] }
  0xfe   :  { %983 = vmatpush3.msra.mxu0 %v306_v49  ;;  %1018 = vmatpush3.msra.mxu1 %v402_v50  ;;  %v363_v47 = vld [vmem:[#allocation4 + $0x328] sm:$0xff]  ;;  %v408_v49 = vld [vmem:[#allocation4 + $0x490] sm:$0xff] }
  0xff   :  { %984 = vmatprep.subr.mxu0 %v351_v51  ;;  %1019 = vmatprep.subr.mxu1 %v447_v52  ;;  %v264_v50 = vld [vmem:[#allocation4 + $0x10] sm:$0xff]  ;;  %v787_v52 = vld [vmem:[#allocation6 + $0xf8] sm:$0xff] }
 0x100   :  { %985 = vmatpush3.msra.mxu0 %v303_v53  ;;  %1020 = vmatpush3.msra.mxu1 %v399_v54  ;;  %v360_v51 = vld [vmem:[#allocation4 + $0x310] sm:$0xff]  ;;  %v771_v53 = vld [vmem:[#allocation6 + $0x78] sm:$0xff] }
 0x101   :  { %986 = vmatprep.subr.mxu0 %v348_v55  ;;  %1021 = vmatprep.subr.mxu1 %v444_v56  ;;  %v786_v54 = vld [vmem:[#allocation6 + $0xf0] sm:$0xff]  ;;  %v785_v56 = vld [vmem:[#allocation6 + $0xe8] sm:$0xff] }
 0x102   :  { %987 = vmatpush3.msra.mxu0 %v300_v57  ;;  %1022 = vmatpush3.msra.mxu1 %v396_v58  ;;  %v770_v55 = vld [vmem:[#allocation6 + $0x70] sm:$0xff]  ;;  %v769_v57 = vld [vmem:[#allocation6 + $0x68] sm:$0xff]  ;;  %v784_v58 = vld [vmem:[#allocation6 + $0xe0] sm:$0xff] }
 0x103   :  { %988 = vmatprep.subr.mxu0 %v345_v59  ;;  %1023 = vmatprep.subr.mxu1 %v441_v60  ;;  %v768_v59 = vld [vmem:[#allocation6 + $0x60] sm:$0xff]  ;;  %v783_v60 = vld [vmem:[#allocation6 + $0xd8] sm:$0xff] }
 0x104   :  { %989 = vmatpush3.msra.mxu0 %v297_v61  ;;  %1024 = vmatpush3.msra.mxu1 %v393_v62  ;;  %v765_v61 = vld [vmem:[#allocation6 + $0x48] sm:$0xff]  ;;  %v780_v62 = vld [vmem:[#allocation6 + $0xc0] sm:$0xff] }
 0x105   :  { %990 = vmatprep.subr.mxu0 %v342_v63  ;;  %1025 = vmatprep.subr.mxu1 %v438_v1  ;;  %v764_v63 = vld [vmem:[#allocation6 + $0x40] sm:$0xff]  ;;  %v779_v1 = vld [vmem:[#allocation6 + $0xb8] sm:$0xff] }
 0x106   :  { %991 = vmatpush3.msra.mxu0 %v294_v2  ;;  %1026 = vmatpush3.msra.mxu1 %v390_v3  ;;  %v763_v2 = vld [vmem:[#allocation6 + $0x38] sm:$0xff]  ;;  %v778_v3 = vld [vmem:[#allocation6 + $0xb0] sm:$0xff] }
 0x107   :  { %992 = vmatprep.subr.mxu0 %v339_v4  ;;  %1027 = vmatprep.subr.mxu1 %v435_v5  ;;  %v762_v4 = vld [vmem:[#allocation6 + $0x30] sm:$0xff]  ;;  %v777_v5 = vld [vmem:[#allocation6 + $0xa8] sm:$0xff] }
 0x108   :  { %993 = vmatpush3.msra.mxu0 %v291_v6  ;;  %1028 = vmatpush3.msra.mxu1 %v387_v7  ;;  %v761_v6 = vld [vmem:[#allocation6 + $0x28] sm:$0xff]  ;;  %v776_v7 = vld [vmem:[#allocation6 + $0xa0] sm:$0xff] }
 0x109   :  { %994 = vmatprep.subr.mxu0 %v336_v8  ;;  %1029 = vmatprep.subr.mxu1 %v432_v9  ;;  %v760_v8 = vld [vmem:[#allocation6 + $0x20] sm:$0xff]  ;;  %v775_v9 = vld [vmem:[#allocation6 + $0x98] sm:$0xff] }
 0x10a   :  { %995 = vmatpush3.msra.mxu0 %v288_v10  ;;  %1030 = vmatpush3.msra.mxu1 %v384_v11  ;;  %v759_v10 = vld [vmem:[#allocation6 + $0x18] sm:$0xff]  ;;  %v774_v11 = vld [vmem:[#allocation6 + $0x90] sm:$0xff] }
 0x10b   :  { %996 = vmatprep.subr.mxu0 %v333_v12  ;;  %1031 = vmatprep.subr.mxu1 %v429_v13  ;;  %v758_v12 = vld [vmem:[#allocation6 + $0x10] sm:$0xff]  ;;  %v773_v13 = vld [vmem:[#allocation6 + $0x88] sm:$0xff] }
 0x10c   :  { %997 = vmatpush3.msra.mxu0 %v285_v14  ;;  %1032 = vmatpush3.msra.mxu1 %v381_v15  ;;  %v757_v14 = vld [vmem:[#allocation6 + $0x8] sm:$0xff]  ;;  %v772_v15 = vld [vmem:[#allocation6 + $0x80] sm:$0xff] }
 0x10d   :  { %998 = vmatprep.subr.mxu0 %v330_v16  ;;  %1033 = vmatprep.subr.mxu1 %v426_v17  ;;  %v756_v16 = vld [vmem:[#allocation6] sm:$0xff]  ;;  %v803_v17 = vld [vmem:[#allocation6 + $0x178] sm:$0xff] }
 0x10e   :  { %999 = vmatpush3.msra.mxu0 %v282_v18  ;;  %1034 = vmatpush3.msra.mxu1 %v378_v19  ;;  %v802_v18 = vld [vmem:[#allocation6 + $0x170] sm:$0xff]  ;;  %v801_v19 = vld [vmem:[#allocation6 + $0x168] sm:$0xff] }
 0x10f   :  { %1000 = vmatprep.subr.mxu0 %v327_v20  ;;  %1035 = vmatprep.subr.mxu1 %v423_v21  ;;  %v800_v20 = vld [vmem:[#allocation6 + $0x160] sm:$0xff]  ;;  %v799_v21 = vld [vmem:[#allocation6 + $0x158] sm:$0xff] }
 0x110   :  { %1001 = vmatpush3.msra.mxu0 %v279_v22  ;;  %1036 = vmatpush3.msra.mxu1 %v375_v26  ;;  %v798_v22 = vld [vmem:[#allocation6 + $0x150] sm:$0xff]  ;;  %v797_v26 = vld [vmem:[#allocation6 + $0x148] sm:$0xff] }
 0x111   :  { %1002 = vmatprep.subr.mxu0 %v324_v28  ;;  %1037 = vmatprep.subr.mxu1 %v420_v29  ;;  %v796_v28 = vld [vmem:[#allocation6 + $0x140] sm:$0xff]  ;;  %v795_v29 = vld [vmem:[#allocation6 + $0x138] sm:$0xff] }
 0x112   :  { %1003 = vmatpush3.msra.mxu0 %v276_v30  ;;  %1038 = vmatpush3.msra.mxu1 %v372_v31  ;;  %v794_v30 = vld [vmem:[#allocation6 + $0x130] sm:$0xff]  ;;  %v793_v31 = vld [vmem:[#allocation6 + $0x128] sm:$0xff] }
 0x113   :  { %1004 = vmatprep.subr.mxu0 %v321_v32  ;;  %1039 = vmatprep.subr.mxu1 %v417_v33  ;;  %v792_v32 = vld [vmem:[#allocation6 + $0x120] sm:$0xff]  ;;  %v791_v33 = vld [vmem:[#allocation6 + $0x118] sm:$0xff] }
 0x114   :  { %1005 = vmatpush3.msra.mxu0 %v273_v34  ;;  %1040 = vmatpush3.msra.mxu1 %v369_v37  ;;  %v790_v34 = vld [vmem:[#allocation6 + $0x110] sm:$0xff]  ;;  %v789_v37 = vld [vmem:[#allocation6 + $0x108] sm:$0xff] }
 0x115   :  { %1006 = vmatprep.subr.mxu0 %v318_v38  ;;  %1041 = vmatprep.subr.mxu1 %v414_v39  ;;  %v788_v38 = vld [vmem:[#allocation6 + $0x100] sm:$0xff] }
 0x116   :  { %1007 = vmatpush3.msra.mxu0 %v270_v40  ;;  %1042 = vmatpush3.msra.mxu1 %v366_v42  ;;  %v454_v39 = vld [vmem:[%s1360_s4] sm:$0x7] }
 0x117   :  { %1008 = vmatprep.subr.mxu0 %v315_v43  ;;  %1043 = vmatprep.subr.mxu1 %v411_v45  ;;  %v459_v40 = vrot.slane %v454_v39, %v94_v25  ;;  %v463_v42 = vrot.slane %v454_v39, %v98_v27  ;;  %v467_v25 = vrot.slane %v454_v39, %v102_v24  ;;  %v978_v24 = vld [vmem:[%s1363_s7] ss:$0 sm:$0xff] }
 0x118   :  { %1009 = vmatpush3.msra.mxu0 %v267_v46  ;;  %1044 = vmatpush3.msra.mxu1 %v363_v47 }
 0x119   :  { %1010 = vmatprep.subr.mxu0 %v312_v48  ;;  %1045 = vmatprep.subr.mxu1 %v408_v49 }
 0x11a   :  { %1011 = vmatpush3.msra.mxu0 %v264_v50  ;;  %1046 = vmatpush3.msra.mxu1 %v360_v51 }
 0x11b   :  { %678 = vmatmul.mubr.f32.vlgmr.msra.gmra.mxu0 %v258_v44  ;;  %748 = vmatmul.mubr.f32.vlgmr.msra.gmra.mxu1 %v260_v41  ;;  %v766_v41 = vld [vmem:[#allocation6 + $0x50] sm:$0xff]  ;;  %v781_v44 = vld [vmem:[#allocation6 + $0xc8] sm:$0xff] }
 0x11c   :  { %1050 = vmatprep.subr.mxu0 %v787_v52  ;;  %1102 = vmatprep.subr.mxu1 %v1223_v0 }
 0x11d   :  { %1051 = vmatpush3.msra.mxu0 %v771_v53  ;;  %1103 = vmatpush3.msra.mxu1 %v803_v17 }
 0x11e   :  { %1052 = vmatprep.subr.mxu0 %v786_v54  ;;  %1104 = vmatprep.subr.mxu1 %v1223_v0 }
 0x11f   :  { %1053 = vmatpush3.msra.mxu0 %v770_v55  ;;  %1105 = vmatpush3.msra.mxu1 %v802_v18 }
 0x120   :  { %1054 = vmatprep.subr.mxu0 %v785_v56  ;;  %1106 = vmatprep.subr.mxu1 %v1223_v0 }
 0x121   :  { %1055 = vmatpush3.msra.mxu0 %v769_v57  ;;  %1107 = vmatpush3.msra.mxu1 %v801_v19 }
 0x122   :  { %1056 = vmatprep.subr.mxu0 %v784_v58  ;;  %1108 = vmatprep.subr.mxu1 %v1223_v0 }
 0x123   :  { %1057 = vmatpush3.msra.mxu0 %v768_v59  ;;  %1109 = vmatpush3.msra.mxu1 %v800_v20 }
 0x124   :  { %1058 = vmatprep.subr.mxu0 %v783_v60  ;;  %1110 = vmatprep.subr.mxu1 %v1223_v0 }
 0x125   :  { %1059 = vmatpush3.msra.mxu0 %v767_v36  ;;  %1111 = vmatpush3.msra.mxu1 %v799_v21 }
 0x126   :  { %1060 = vmatprep.subr.mxu0 %v782_v35  ;;  %1112 = vmatprep.subr.mxu1 %v1223_v0 }
 0x127   :  { %1061 = vmatpush3.msra.mxu0 %v766_v41  ;;  %1113 = vmatpush3.msra.mxu1 %v798_v22 }
 0x128   :  { %1062 = vmatprep.subr.mxu0 %v781_v44  ;;  %1114 = vmatprep.subr.mxu1 %v1223_v0  ;;  %v977_v44 = vld [vmem:[%s1362_s6] ss:$0 sm:$0xff] }
 0x129   :  { %1063 = vmatpush3.msra.mxu0 %v765_v61  ;;  %1115 = vmatpush3.msra.mxu1 %v797_v26 }
 0x12a   :  { %1064 = vmatprep.subr.mxu0 %v780_v62  ;;  %1116 = vmatprep.subr.mxu1 %v1223_v0 }
 0x12b   :  { %1065 = vmatpush3.msra.mxu0 %v764_v63  ;;  %1117 = vmatpush3.msra.mxu1 %v796_v28 }
 0x12c   :  { %1066 = vmatprep.subr.mxu0 %v779_v1  ;;  %1118 = vmatprep.subr.mxu1 %v1223_v0 }
 0x12d   :  { %1067 = vmatpush3.msra.mxu0 %v763_v2  ;;  %1119 = vmatpush3.msra.mxu1 %v795_v29  ;;  %v979_v2 = vld [vmem:[%s1364_s8] ss:$0 sm:$0xff] }
 0x12e   :  { %1068 = vmatprep.subr.mxu0 %v778_v3  ;;  %1120 = vmatprep.subr.mxu1 %v1223_v0 }
 0x12f   :  { %1069 = vmatpush3.msra.mxu0 %v762_v4  ;;  %1121 = vmatpush3.msra.mxu1 %v794_v30 }
 0x130   :  { %1070 = vmatprep.subr.mxu0 %v777_v5  ;;  %1122 = vmatprep.subr.mxu1 %v1223_v0 }
 0x131   :  { %1071 = vmatpush3.msra.mxu0 %v761_v6  ;;  %1123 = vmatpush3.msra.mxu1 %v793_v31 }
 0x132   :  { %1072 = vmatprep.subr.mxu0 %v776_v7  ;;  %1124 = vmatprep.subr.mxu1 %v1223_v0 }
 0x133   :  { %1073 = vmatpush3.msra.mxu0 %v760_v8  ;;  %1125 = vmatpush3.msra.mxu1 %v792_v32 }
 0x134   :  { %1074 = vmatprep.subr.mxu0 %v775_v9  ;;  %1126 = vmatprep.subr.mxu1 %v1223_v0 }
 0x135   :  { %1075 = vmatpush3.msra.mxu0 %v759_v10  ;;  %1127 = vmatpush3.msra.mxu1 %v791_v33 }
 0x136   :  { %1076 = vmatprep.subr.mxu0 %v774_v11  ;;  %1128 = vmatprep.subr.mxu1 %v1223_v0 }
 0x137   :  { %1077 = vmatpush3.msra.mxu0 %v758_v12  ;;  %1129 = vmatpush3.msra.mxu1 %v790_v34 }
 0x138   :  { %1078 = vmatprep.subr.mxu0 %v773_v13  ;;  %1130 = vmatprep.subr.mxu1 %v1223_v0 }
 0x139   :  { %1079 = vmatpush3.msra.mxu0 %v757_v14  ;;  %1131 = vmatpush3.msra.mxu1 %v789_v37 }
 0x13a   :  { %1080 = vmatprep.subr.mxu0 %v772_v15  ;;  %1132 = vmatprep.subr.mxu1 %v1223_v0 }
 0x13b   :  { %1081 = vmatpush3.msra.mxu0 %v756_v16  ;;  %1133 = vmatpush3.msra.mxu1 %v788_v38 }
 0x13c   :  { %1134 = vmatprep.mubr.msk.f32.mxu1 %vm1224_vm1, %v1223_v0 }
 0x1ba   :  { %v537_v43 = vpop.f32.mrf.mxu0  ;;  %v608_v45 = vpop.f32.mrf.mxu1 }
 0x1bb   :  { %v538_v46 = vadd.f32 %v537_v43, %v459_v40 }
 0x1bc   :  { %v539_v47 = vpop.f32.mrf.mxu0  ;;  %v610_v50 = vpop.f32.mrf.mxu1 }
 0x1bd   :  { %v540_v48 = vadd.f32 %v539_v47, %v463_v42  ;;  %v609_v49 = vadd.f32 %v608_v45, %v538_v46 }
 0x1bf   :  { %v611_v51 = vadd.f32 %v610_v50, %v540_v48  ;;  %v753_v0 = vmax.f32 %v609_v49, 0.0 }
 0x1c1   :  { %v754_v52 = vmax.f32 %v611_v51, 0.0 }
 0x1c3   :  { %875 = vmatprep.mubr.f32.mxu0 %v754_v52 }
 0x1c4   :  { %876 = vmatmul.mubr.f32.vlgmr.msra.gmra.mxu0 %v753_v0 }
 0x1db   :  { %v1012_v53 = vpop.f32.mrf.mxu0  ;;  %v1047_v54 = vpop.f32.mrf.mxu1 }
 0x1dd   :  { %v1013_v55 = vpop.f32.mrf.mxu0  ;;  %v1048_v56 = vpop.f32.mrf.mxu1 }
 0x1de   :  { %v1014_v27 = vadd.f32 %v1013_v55, %v1012_v53  ;;  %v1049_v58 = vadd.f32 %v1048_v56, %v1047_v54 }
 0x1e0   :  { %v680_v57 = vadd.f32 %v1014_v27, %v467_v25 }
 0x1e2   :  { %v750_v59 = vadd.f32 %v1049_v58, %v680_v57 }
 0x1e4   :  { %v755_v60 = vmax.f32 %v750_v59, 0.0 }
 0x1e6   :  { %1135 = vmatmul.mubr.f32.vlgmr.msra.gmra.mxu1 %v755_v60 }
 0x284   :  { %v1082_v36 = vpop.f32.mrf.mxu0 }
 0x286   :  { %v1083_v35 = vpop.f32.mrf.mxu0 }
 0x287   :  { %v1084_v41 = vadd.f32 %v1083_v35, %v1082_v36 }
 0x289   :  { %v878_v61 = vadd.f32 %v1084_v41, %v977_v44 }
 0x2a6   :  { %v947_v62 = vpop.f32.mrf.mxu1 }
 0x2a7   :  { %v948_v63 = vadd.f32 %v947_v62, %v878_v61 }
 0x2a8   :  { %v1136_v23 = vpop.f32.mrf.mxu1 }
 0x2a9   :  { %1148 = vtanh.f32 %v948_v63 }
 0x2b6   :  { %v1149_v1 = vpop.eup %1148 }
 0x2b7   :  { %v959_v3 = vmul.f32 %v1149_v1, %v978_v24 }
 0x2b9   :  { %v967_v4 = vadd.f32 %v979_v2, %v959_v3 }
 0x2bb   :  { %968 = vst [vmem:[%s1365_s9] sm:$0xff] %v967_v4 }
 0x2bc   :  { %973 = vsyncpa [#allocation3], 1 }
 0x2bd   :  { %974 = vsyncpa [#allocation5], 1 }

</bundles_post_ra>
